<compile_context>
chip_gen: v6e
topology: v6e:2x2x1
jax: 0.10.0
libtpu: 0.0.40
codegen_flags: <defaults>
</compile_context>

<pallas_src>
import functools
import math

import jax
import jax.numpy as jnp
from jax.experimental import pallas as pl
from jax.experimental.pallas import tpu as pltpu


_MIN_TB = 256     # minimum batch tile for large batches (~85% of HBM roofline)
_MAX_TB = 1024


def _round_up(n: int, m: int) -> int:
    return ((n + m - 1) // m) * m


def _vmem_limits():
    """Pick (vmem_limit_bytes, tile budget) from the actual part at trace time.
    v5e/v6e (128 MiB physical) -> 64 MiB limit; v7x (64 MiB) -> 32 MiB limit."""
    cap = 64 * 1024 * 1024  # conservative default if the query is unavailable
    try:
        info = pltpu.get_tpu_info()
        cap = int(getattr(info, "vmem_capacity_bytes", cap))
    except Exception:
        pass
    limit = min(max(cap // 2, 32 * 1024 * 1024), 96 * 1024 * 1024)
    budget = (limit * 3) // 4
    return limit, budget


def _pick_batch_tile(batch: int, cin: int, wp: int, cout: int,
                     x_isz: int, w_isz: int, out_isz: int,
                     sub: int, budget: int) -> int:
    """Largest batch tile (multiple of `sub`, <= _MAX_TB) whose pipelined
    working set fits the VMEM budget next to the resident weight slab."""
    # Resident weight slab (Buffered(1): one copy; the double-buffer fallback
    # still fits inside the budget headroom).
    w_bytes = cin * wp * w_isz
    # Per batch-row VMEM: double-buffered x and out tiles (lane-padded widths,
    # each in its own dtype) plus the f32 y intermediate.
    per_row = (2 * _round_up(cin, 128) * x_isz
               + 2 * _round_up(cout, 128) * out_isz
               + wp * 4)
    avail = budget - w_bytes
    if avail >= _MIN_TB * per_row:
        tb = min(avail // per_row, _MAX_TB)
    else:
        # Never degrade to tiny (8-row) tiles; oversized slabs should be
        # N-tiled instead (see TODO at top of file).
        tb = _MIN_TB
    # Guarantee >= 2 (ideally 4) grid steps for large batches so the "parallel"
    # axis can shard across v7x's two TensorCores and DMA overlaps compute.
    if batch >= 2 * _MIN_TB:
        tb = max(min(tb, _round_up(pl.cdiv(batch, 4), sub)), _MIN_TB)
    tb = min(int(tb), _round_up(batch, sub))
    tb = max(sub, (int(tb) // sub) * sub)
    return int(tb)


def _glu_kernel(x_ref, w_ref, o_ref, *, cout):
    x = x_ref[...]
    if x.dtype != w_ref.dtype:
        # In-kernel cast to the compute dtype (hides under the tile DMA; avoids
        # a separate wrapper-side astype pass over HBM).
        x = x.astype(w_ref.dtype)
    # Single MXU pass over the fused (cin, wp) slab; f32 accumulation.
    y = jnp.dot(x, w_ref[...], preferred_element_type=jnp.float32)
    a = y[:, :cout]              # value half
    g = y[:, cout:2 * cout]      # gate half (adjacent columns)
    o_ref[...] = (a * jax.nn.sigmoid(g)).astype(o_ref.dtype)


def pack_glu_weight(weight: jax.Array, compute_dtype=None) -> jax.Array:
    """Pack the PyTorch Linear weight (2*cout, cin) into one lane-dense
    (cin, round_up(2*cout, 128)) slab: value columns [0, cout), gate columns
    [cout, 2*cout), zero padding after.  Call ONCE at init -- for training,
    store the parameter in this layout rather than re-packing each step."""
    two_out, cin = weight.shape
    assert two_out % 2 == 0
    cout = two_out // 2
    wp = max(_round_up(2 * cout, 128), 128)
    dtype = weight.dtype if compute_dtype is None else compute_dtype
    w_packed = jnp.zeros((cin, wp), dtype)
    w_packed = w_packed.at[:, : 2 * cout].set(weight.T.astype(dtype))
    return w_packed


def glu_layer_packed(x: jax.Array, w_packed: jax.Array, out_channels: int,
                     out_dtype=None) -> jax.Array:
    """Hot-path entry: x (B, cin), w_packed from pack_glu_weight -> (B, cout).
    Set out_dtype=jnp.bfloat16 to halve the store stream when downstream
    tolerates it (default keeps x.dtype)."""
    batch, cin = x.shape
    cin_w, wp = w_packed.shape
    assert cin == cin_w, "x / packed-weight in_channels mismatch"
    assert wp % 128 == 0 and 2 * out_channels <= wp
    if out_dtype is None:
        out_dtype = x.dtype

    x_isz = jnp.dtype(x.dtype).itemsize
    w_isz = jnp.dtype(w_packed.dtype).itemsize
    o_isz = jnp.dtype(out_dtype).itemsize
    # bf16 tiles pack sublanes as (16, 128): round tb to 16 for 16-bit tiles.
    sub = 16 if min(x_isz, o_isz) == 2 else 8

    vmem_limit, vmem_budget = _vmem_limits()
    tb = _pick_batch_tile(batch, cin, wp, out_channels,
                          x_isz, w_isz, o_isz, sub, vmem_budget)
    grid = (pl.cdiv(batch, tb),)

    kernel = functools.partial(_glu_kernel, cout=out_channels)

    def _call(w_spec):
        return pl.pallas_call(
            kernel,
            out_shape=jax.ShapeDtypeStruct((batch, out_channels), out_dtype),
            grid_spec=pltpu.PrefetchScalarGridSpec(
                num_scalar_prefetch=0,
                grid=grid,
                in_specs=[
                    # x: streamed in batch tiles (auto double-buffered).
                    pl.BlockSpec((tb, cin), lambda i: (i, 0)),
                    # fused weight slab: resident across all grid steps.
                    w_spec,
                ],
                # true-shape output: no padded store + wrapper slice pass.
                out_specs=pl.BlockSpec((tb, out_channels), lambda i: (i, 0)),
            ),
            compiler_params=pltpu.CompilerParams(
                dimension_semantics=("parallel",),
                vmem_limit_bytes=vmem_limit,
            ),
        )(x, w_packed)

    plain_w_spec = pl.BlockSpec((cin, wp), lambda i: (0, 0))
    try:
        buffered_w_spec = pl.BlockSpec((cin, wp), lambda i: (0, 0),
                                       pipeline_mode=pl.Buffered(1))
    except TypeError:  # older BlockSpec without pipeline_mode
        buffered_w_spec = plain_w_spec

    if buffered_w_spec is plain_w_spec:
        return _call(plain_w_spec)
    try:
        return _call(buffered_w_spec)
    except Exception:
        # Installed Pallas rejected Buffered(1) for pallas_call pipelining; the
        # default double-buffered resident slab is still correct (and counted
        # conservatively enough by the tile picker).
        return _call(plain_w_spec)


def glu_layer(x: jax.Array, weight: jax.Array, compute_dtype=None) -> jax.Array:
    """Convenience wrapper.  Packs the weight per call; for training / repeated
    forwards, store the parameter packed (pack_glu_weight once) and call
    glu_layer_packed to avoid the per-step re-pack traffic."""
    cout = weight.shape[0] // 2
    w_packed = pack_glu_weight(weight, compute_dtype)
    return glu_layer_packed(x, w_packed, cout)


def glu_layer_ref(x: jax.Array, weight: jax.Array) -> jax.Array:
    """Pure-JAX reference matching torch: Linear(bias=False) + GLU(dim=-1)."""
    y = x @ weight.T
    cout = weight.shape[0] // 2
    return y[:, :cout] * jax.nn.sigmoid(y[:, cout:])


if __name__ == "__main__":
    in_channels = 32
    out_channels = 16
    batch = 2

    key = jax.random.PRNGKey(0)
    kx, kw = jax.random.split(key)

    # Deterministic init mimicking nn.Linear.reset_parameters():
    # kaiming_uniform_(a=sqrt(5)) -> U(-1/sqrt(fan_in), 1/sqrt(fan_in))
    bound = 1.0 / math.sqrt(in_channels)
    weight = jax.random.uniform(
        kw, (out_channels * 2, in_channels), jnp.float32, -bound, bound
    )
    x = jax.random.normal(kx, (batch, in_channels), jnp.float32)

    # Pack once (hoisted out of the hot path), then run the kernel.
    w_packed = pack_glu_weight(weight)
    out = glu_layer_packed(x, w_packed, out_channels)
    out = jax.block_until_ready(out)

    ref = glu_layer_ref(x, weight)
    assert out.shape == (batch, out_channels)
    assert jnp.allclose(out, ref, atol=1e-5, rtol=1e-5), (
        f"max abs err {jnp.max(jnp.abs(out - ref))}"
    )

    print("KERNEL_OK")
</pallas_src>

<mosaic_0001>
module attributes {stable_mosaic.version = 11 : i64} {
  func.func @_glu_kernel(%arg0: i32, %arg1: memref<8x32xf32, #tpu.memory_space<vmem>>, %arg2: memref<32x128xf32, #tpu.memory_space<vmem>>, %arg3: memref<8x16xf32, #tpu.memory_space<vmem>>) attributes {dimension_semantics = [#tpu.dimension_semantics<parallel>], iteration_bounds = array<i64: 1>, scalar_prefetch = 0 : i64, scratch_operands = 0 : i64, tpu.core_type = #tpu.core_type<tc>, window_params = [{transform_indices = @transform_0, window_bounds = array<i64: 8, 32>}, {pipeline_mode = #tpu.pipeline_mode<synchronous>, transform_indices = @transform_1, window_bounds = array<i64: 32, 128>}, {transform_indices = @transform_2, window_bounds = array<i64: 8, 16>}]} {
    %c0 = arith.constant 0 : index
    %c0_0 = arith.constant 0 : index
    %0 = vector.load %arg1[%c0, %c0_0] : memref<8x32xf32, #tpu.memory_space<vmem>>, vector<8x32xf32>
    %c0_1 = arith.constant 0 : index
    %c0_2 = arith.constant 0 : index
    %1 = vector.load %arg2[%c0_1, %c0_2] : memref<32x128xf32, #tpu.memory_space<vmem>>, vector<32x128xf32>
    %cst = arith.constant dense<0.000000e+00> : vector<8x128xf32>
    %2 = tpu.matmul %0, %1, %cst {dimension_numbers = #tpu.dot_dimension_numbers<[1], [0], [0], [1], [0, 0, 1, 1], [], []>} : vector<8x32xf32>, vector<32x128xf32>, vector<8x128xf32> -> vector<8x128xf32>
    %3 = vector.extract_strided_slice %2 {offsets = [0, 0], sizes = [8, 16], strides = [1, 1]} : vector<8x128xf32> to vector<8x16xf32>
    %4 = vector.extract_strided_slice %2 {offsets = [0, 16], sizes = [8, 16], strides = [1, 1]} : vector<8x128xf32> to vector<8x16xf32>
    %5 = arith.negf %4 : vector<8x16xf32>
    %6 = math.exp %5 : vector<8x16xf32>
    %cst_3 = arith.constant 1.000000e+00 : f32
    %7 = vector.broadcast %cst_3 : f32 to vector<8x16xf32>
    %8 = arith.addf %7, %6 : vector<8x16xf32>
    %9 = arith.divf %7, %8 : vector<8x16xf32>
    %10 = arith.mulf %3, %9 : vector<8x16xf32>
    %c0_4 = arith.constant 0 : index
    %c0_5 = arith.constant 0 : index
    %11 = vector.load %arg3[%c0_4, %c0_5] : memref<8x16xf32, #tpu.memory_space<vmem>>, vector<8x16xf32>
    tpu.vector_store %arg3[%c0_4, %c0_5], %10 {strides = array<i32>} : memref<8x16xf32, #tpu.memory_space<vmem>>, vector<8x16xf32>,
    return
  }
  func.func @transform_0(%arg0: i32) -> (i32, i32) {
    %c0_i32 = arith.constant 0 : i32
    %c0_i32_0 = arith.constant 0 : i32
    return %arg0, %c0_i32 : i32, i32
  }
  func.func @transform_1(%arg0: i32) -> (i32, i32) {
    %c0_i32 = arith.constant 0 : i32
    %c0_i32_0 = arith.constant 0 : i32
    %c0_i32_1 = arith.constant 0 : i32
    return %c0_i32, %c0_i32_0 : i32, i32
  }
  func.func @transform_2(%arg0: i32) -> (i32, i32) {
    %c0_i32 = arith.constant 0 : i32
    %c0_i32_0 = arith.constant 0 : i32
    return %arg0, %c0_i32 : i32, i32
  }
}

module attributes {stable_mosaic.version = 11 : i64} {
  func.func @_glu_kernel(%arg0: i32, %arg1: memref<8x32xf32, #tpu.memory_space<vmem>>, %arg2: memref<32x128xf32, #tpu.memory_space<vmem>>, %arg3: memref<8x16xf32, #tpu.memory_space<vmem>>) attributes {dimension_semantics = [#tpu.dimension_semantics<parallel>], iteration_bounds = array<i64: 1>, scalar_prefetch = 0 : i64, scratch_operands = 0 : i64, tpu.core_type = #tpu.core_type<tc>, window_params = [{transform_indices = @transform_0, window_bounds = array<i64: 8, 32>}, {pipeline_mode = #tpu.pipeline_mode<synchronous>, transform_indices = @transform_1, window_bounds = array<i64: 32, 128>}, {transform_indices = @transform_2, window_bounds = array<i64: 8, 16>}]} {
    %c0 = arith.constant 0 : index
    %c0_0 = arith.constant 0 : index
    %0 = vector.load %arg1[%c0, %c0_0] : memref<8x32xf32, #tpu.memory_space<vmem>>, vector<8x32xf32>
    %c0_1 = arith.constant 0 : index
    %c0_2 = arith.constant 0 : index
    %1 = vector.load %arg2[%c0_1, %c0_2] : memref<32x128xf32, #tpu.memory_space<vmem>>, vector<32x128xf32>
    %cst = arith.constant dense<0.000000e+00> : vector<8x128xf32>
    %2 = tpu.matmul %0, %1, %cst {dimension_numbers = #tpu.dot_dimension_numbers<[1], [0], [0], [1], [0, 0, 1, 1], [], []>} : vector<8x32xf32>, vector<32x128xf32>, vector<8x128xf32> -> vector<8x128xf32>
    %3 = vector.extract_strided_slice %2 {offsets = [0, 0], sizes = [8, 16], strides = [1, 1]} : vector<8x128xf32> to vector<8x16xf32>
    %4 = vector.extract_strided_slice %2 {offsets = [0, 16], sizes = [8, 16], strides = [1, 1]} : vector<8x128xf32> to vector<8x16xf32>
    %5 = arith.negf %4 : vector<8x16xf32>
    %6 = math.exp %5 : vector<8x16xf32>
    %cst_3 = arith.constant 1.000000e+00 : f32
    %7 = vector.broadcast %cst_3 : f32 to vector<8x16xf32>
    %8 = arith.addf %7, %6 : vector<8x16xf32>
    %9 = arith.divf %7, %8 : vector<8x16xf32>
    %10 = arith.mulf %3, %9 : vector<8x16xf32>
    %c0_4 = arith.constant 0 : index
    %c0_5 = arith.constant 0 : index
    %11 = vector.load %arg3[%c0_4, %c0_5] : memref<8x16xf32, #tpu.memory_space<vmem>>, vector<8x16xf32>
    tpu.vector_store %arg3[%c0_4, %c0_5], %10 {strides = array<i32>} : memref<8x16xf32, #tpu.memory_space<vmem>>, vector<8x16xf32>,
    return
  }
  func.func @transform_0(%arg0: i32) -> (i32, i32) {
    %c0_i32 = arith.constant 0 : i32
    %c0_i32_0 = arith.constant 0 : i32
    return %arg0, %c0_i32 : i32, i32
  }
  func.func @transform_1(%arg0: i32) -> (i32, i32) {
    %c0_i32 = arith.constant 0 : i32
    %c0_i32_0 = arith.constant 0 : i32
    %c0_i32_1 = arith.constant 0 : i32
    return %c0_i32, %c0_i32_0 : i32, i32
  }
  func.func @transform_2(%arg0: i32) -> (i32, i32) {
    %c0_i32 = arith.constant 0 : i32
    %c0_i32_0 = arith.constant 0 : i32
    return %arg0, %c0_i32 : i32, i32
  }
}

</mosaic_0001>

<bundles_post_ra>
// kernel: tpu_custom_call.1
= control target key start
LH: loop header
LB: loop body
LE: loop exit
PB: predicated region body
PF: predicated region fallthrough
CT: control target
= control target key end

     0   :  { %7 = vsyncpa [#allocation3], 0  ;;  %s288_s0 = inlined_call_operand.hbm [shape: f32[2,32], index: 0, kind: input, shape index: {}]   ;;  %s289_s1 = inlined_call_operand.hbm [shape: f32[32,128], index: 1, kind: input, shape index: {}]   ;;  %s290_s2 = inlined_call_operand.hbm [shape: f32[2,16], index: 2, kind: output, shape index: {}]  }
   0x1   :  { %8 = vsyncpa [#allocation6], 0 }
   0x2   :  { %9 = vsyncpa [#allocation4], 0 }
   0x3   :  { %14 = vsyncadd [#allocation3], 96  ;;  %s248_s9 = smov [#allocation2]  }
   0x4   :  { %s15_s10 = sshll.u32 %s248_s9, 4  ;;  %s16_s10 = int_to_ptr.vmem [resolvable:$true] %s15_s10 }
   0x5   :  { %s190_s11 = scalar_lea.vmem %s16_s10, 32  ;;  %s194_s12 = scalar_lea.vmem %s16_s10, 128 }
   0x6   :  { %p191_p0 = scmp.ne.s32.totalorder %s16_s10, %s190_s11  ;;  %p195_p1 = scmp.lt.s32.totalorder %s16_s10, %s16_s10 }
   0x7   :  { %p196_p2 = scmp.lt.s32.totalorder %s194_s12, %s190_s11 }
   0x9   :  { %p197_p3 = por %p196_p2, %p195_p1 }
   0xb   :  { %p198_p4 = pnand %p197_p3, %p191_p0 }
   0xd   :  { %201 = shalt.err (!%p198_p4)
}
   0xe   :  { %s249_s13 = smov 32   ;;  %s250_s14 = smov 2  }
   0xf   :  { %21 = dma.hbm_to_vmem [thread:$0]  %s288_s0, 32, %s16_s10, [#allocation3], %s249_s13, %s249_s13, %s250_s14  }
  0x10   :  { %s251_s17 = smov [#allocation5]  }
  0x11   :  { %s27_s18 = sshll.u32 %s251_s17, 4  ;;  %s28_s18 = int_to_ptr.vmem [resolvable:$true] %s27_s18 }
  0x12   :  { %s210_s19 = scalar_lea.vmem %s28_s18, 512  ;;  %p215_p6 = scmp.lt.s32.totalorder %s28_s18, %s28_s18 }
  0x13   :  { %p211_p5 = scmp.ne.s32.totalorder %s28_s18, %s210_s19  ;;  %p216_p7 = scmp.lt.s32.totalorder %s210_s19, %s210_s19 }
  0x15   :  { %p217_p8 = por %p216_p7, %p215_p6 }
  0x17   :  { %p218_p9 = pnand %p217_p8, %p211_p5 }
  0x19   :  { %221 = shalt.err (!%p218_p9)
}
  0x1a   :  { %s252_s20 = smov 128   ;;  %s253_s21 = smov 8  }
  0x1b   :  { %33 = dma.hbm_to_vmem [thread:$0]  %s289_s1, 512, %s28_s18, [#allocation6], %s252_s20, %s252_s20, %s253_s21  }
  0x1c   :  { %242 = dma.done.wait [#allocation3], 128  }
  0x1d   :  { %243 = vsyncadd [#allocation3], 4294967168 }
  0x1e   :  { %244 = dma.done.wait [#allocation6], 512  }
  0x1f   :  { %245 = vsyncadd [#allocation6], 4294966784  ;;  %v254_v0 = vmov 0.0   ;;  %vm255_vm0 = vmmov 0   ;;  %v44_v1 = vld [vmem:[#allocation5 + $0x18] sm:$0xff]  ;;  %v43_v2 = vld [vmem:[#allocation5 + $0x10] sm:$0xff] }
  0x20   :  { %157 = vmatprep.subr.mxu0 %v254_v0  ;;  %165 = vmatprep.mubr.msk.f32.mxu0 %vm255_vm0, %v254_v0  ;;  %v42_v3 = vld [vmem:[#allocation5 + $0x8] sm:$0xff]  ;;  %v41_v4 = vld [vmem:[#allocation5] sm:$0xff]  ;;  %v40_v5 = vld [vmem:[#allocation2] sm:$0xff]  ;;  %vm45_vm1 = vcmask 261120   ;;  %s256_s0 = smov 112   ;;  %vm130_vm2 = vcmask 130048  }
  0x21   :  { %158 = vmatpush3.msra.mxu0 %v44_v1 }
  0x22   :  { %159 = vmatprep.subr.mxu0 %v254_v0 }
  0x23   :  { %160 = vmatpush3.msra.mxu0 %v43_v2 }
  0x24   :  { %161 = vmatprep.subr.mxu0 %v254_v0 }
  0x25   :  { %162 = vmatpush3.msra.mxu0 %v42_v3 }
  0x26   :  { %163 = vmatprep.subr.mxu0 %v254_v0 }
  0x27   :  { %164 = vmatpush3.msra.mxu0 %v41_v4 }
  0x28   :  { %166 = vmatmul.mubr.msk.f32.vlgmr.msra.gmra.mxu0 %vm45_vm1, %v40_v5 }
  0xe8   :  { %v115_v6 = vpop.f32.mrf.mxu0 }
  0xe9   :  { %v151_v7 = vmul.f32 -1.442695, %v115_v6 }
  0xea   :  { %v167_v8 = vpop.f32.mrf.mxu0 }
  0xeb   :  { %178 = vpow2.f32 %v151_v7 }
  0xf8   :  { %v179_v9 = vpop.eup %178 }
  0xf9   :  { %v122_v10 = vadd.f32 1.0, %v179_v9 }
  0xfb   :  { %180 = vrcp.f32 %v122_v10 }
 0x108   :  { %v181_v11 = vpop.eup %180 }
 0x109   :  { %126 = vrot.lane.b32.xlu0 %v181_v11, %s256_s0 }
 0x17b   :  { %v127_v12 = vpop.permute.xlu0 %126 }
 0x17c   :  { %v129_v13 = vmul.f32 %v127_v12, %v115_v6 }
 0x17e   :  { %131 = vst.msk [vmem:[#allocation7] sm:$0xff] %vm130_vm2, %v129_v13 }
 0x17f   :  { %136 = vsyncadd [#allocation4], 96  ;;  %s257_s1 = smov [#allocation7]  }
 0x180   :  { %s137_s24 = sshll.u32 %s257_s1, 4  ;;  %s138_s24 = int_to_ptr.vmem [resolvable:$true] %s137_s24 }
 0x181   :  { %s222_s25 = scalar_lea.vmem %s138_s24, 32  ;;  %s226_s26 = scalar_lea.vmem %s138_s24, 128 }
 0x182   :  { %p223_p10 = scmp.ne.s32.totalorder %s138_s24, %s222_s25  ;;  %p227_p11 = scmp.lt.s32.totalorder %s138_s24, %s138_s24 }
 0x183   :  { %p228_p12 = scmp.lt.s32.totalorder %s226_s26, %s222_s25 }
 0x185   :  { %p229_p13 = por %p228_p12, %p227_p11 }
 0x187   :  { %p230_p0 = pnand %p229_p13, %p223_p10 }
 0x189   :  { %233 = shalt.err (!%p230_p0)
}
 0x18a   :  { %143 = dma.vmem_to_hbm [thread:$0]  %s138_s24, 32, %s290_s2, [#allocation4], %s249_s13, %s249_s13, %s250_s14  }
 0x18b   :  { %246 = dma.done.wait [#allocation4], 128  }
 0x18c   :  { %247 = vsyncadd [#allocation4], 4294967168 }
 0x18d   :  { %147 = vsyncpa [#allocation3], 1 }
 0x18e   :  { %148 = vsyncpa [#allocation6], 1 }
 0x18f   :  { %149 = vsyncpa [#allocation4], 1 }

// kernel: tpu_custom_call.1
= control target key start
LH: loop header
LB: loop body
LE: loop exit
PB: predicated region body
PF: predicated region fallthrough
CT: control target
= control target key end

     0   :  { %7 = vsyncpa [#allocation3], 0  ;;  %s288_s0 = inlined_call_operand.hbm [shape: f32[2,32], index: 0, kind: input, shape index: {}]   ;;  %s289_s1 = inlined_call_operand.hbm [shape: f32[32,128], index: 1, kind: input, shape index: {}]   ;;  %s290_s2 = inlined_call_operand.hbm [shape: f32[2,16], index: 2, kind: output, shape index: {}]  }
   0x1   :  { %8 = vsyncpa [#allocation6], 0 }
   0x2   :  { %9 = vsyncpa [#allocation4], 0 }
   0x3   :  { %14 = vsyncadd [#allocation3], 96  ;;  %s248_s9 = smov [#allocation2]  }
   0x4   :  { %s15_s10 = sshll.u32 %s248_s9, 4  ;;  %s16_s10 = int_to_ptr.vmem [resolvable:$true] %s15_s10 }
   0x5   :  { %s190_s11 = scalar_lea.vmem %s16_s10, 32  ;;  %s194_s12 = scalar_lea.vmem %s16_s10, 128 }
   0x6   :  { %p191_p0 = scmp.ne.s32.totalorder %s16_s10, %s190_s11  ;;  %p195_p1 = scmp.lt.s32.totalorder %s16_s10, %s16_s10 }
   0x7   :  { %p196_p2 = scmp.lt.s32.totalorder %s194_s12, %s190_s11 }
   0x9   :  { %p197_p3 = por %p196_p2, %p195_p1 }
   0xb   :  { %p198_p4 = pnand %p197_p3, %p191_p0 }
   0xd   :  { %201 = shalt.err (!%p198_p4)
}
   0xe   :  { %s249_s13 = smov 32   ;;  %s250_s14 = smov 2  }
   0xf   :  { %21 = dma.hbm_to_vmem [thread:$0]  %s288_s0, 32, %s16_s10, [#allocation3], %s249_s13, %s249_s13, %s250_s14  }
  0x10   :  { %s251_s17 = smov [#allocation5]  }
  0x11   :  { %s27_s18 = sshll.u32 %s251_s17, 4  ;;  %s28_s18 = int_to_ptr.vmem [resolvable:$true] %s27_s18 }
  0x12   :  { %s210_s19 = scalar_lea.vmem %s28_s18, 512  ;;  %p215_p6 = scmp.lt.s32.totalorder %s28_s18, %s28_s18 }
  0x13   :  { %p211_p5 = scmp.ne.s32.totalorder %s28_s18, %s210_s19  ;;  %p216_p7 = scmp.lt.s32.totalorder %s210_s19, %s210_s19 }
  0x15   :  { %p217_p8 = por %p216_p7, %p215_p6 }
  0x17   :  { %p218_p9 = pnand %p217_p8, %p211_p5 }
  0x19   :  { %221 = shalt.err (!%p218_p9)
}
  0x1a   :  { %s252_s20 = smov 128   ;;  %s253_s21 = smov 8  }
  0x1b   :  { %33 = dma.hbm_to_vmem [thread:$0]  %s289_s1, 512, %s28_s18, [#allocation6], %s252_s20, %s252_s20, %s253_s21  }
  0x1c   :  { %242 = dma.done.wait [#allocation3], 128  }
  0x1d   :  { %243 = vsyncadd [#allocation3], 4294967168 }
  0x1e   :  { %244 = dma.done.wait [#allocation6], 512  }
  0x1f   :  { %245 = vsyncadd [#allocation6], 4294966784  ;;  %v254_v0 = vmov 0.0   ;;  %vm255_vm0 = vmmov 0   ;;  %v44_v1 = vld [vmem:[#allocation5 + $0x18] sm:$0xff]  ;;  %v43_v2 = vld [vmem:[#allocation5 + $0x10] sm:$0xff] }
  0x20   :  { %157 = vmatprep.subr.mxu0 %v254_v0  ;;  %165 = vmatprep.mubr.msk.f32.mxu0 %vm255_vm0, %v254_v0  ;;  %v42_v3 = vld [vmem:[#allocation5 + $0x8] sm:$0xff]  ;;  %v41_v4 = vld [vmem:[#allocation5] sm:$0xff]  ;;  %v40_v5 = vld [vmem:[#allocation2] sm:$0xff]  ;;  %vm45_vm1 = vcmask 261120   ;;  %s256_s0 = smov 112   ;;  %vm130_vm2 = vcmask 130048  }
  0x21   :  { %158 = vmatpush3.msra.mxu0 %v44_v1 }
  0x22   :  { %159 = vmatprep.subr.mxu0 %v254_v0 }
  0x23   :  { %160 = vmatpush3.msra.mxu0 %v43_v2 }
  0x24   :  { %161 = vmatprep.subr.mxu0 %v254_v0 }
  0x25   :  { %162 = vmatpush3.msra.mxu0 %v42_v3 }
  0x26   :  { %163 = vmatprep.subr.mxu0 %v254_v0 }
  0x27   :  { %164 = vmatpush3.msra.mxu0 %v41_v4 }
  0x28   :  { %166 = vmatmul.mubr.msk.f32.vlgmr.msra.gmra.mxu0 %vm45_vm1, %v40_v5 }
  0xe8   :  { %v115_v6 = vpop.f32.mrf.mxu0 }
  0xe9   :  { %v151_v7 = vmul.f32 -1.442695, %v115_v6 }
  0xea   :  { %v167_v8 = vpop.f32.mrf.mxu0 }
  0xeb   :  { %178 = vpow2.f32 %v151_v7 }
  0xf8   :  { %v179_v9 = vpop.eup %178 }
  0xf9   :  { %v122_v10 = vadd.f32 1.0, %v179_v9 }
  0xfb   :  { %180 = vrcp.f32 %v122_v10 }
 0x108   :  { %v181_v11 = vpop.eup %180 }
 0x109   :  { %126 = vrot.lane.b32.xlu0 %v181_v11, %s256_s0 }
 0x17b   :  { %v127_v12 = vpop.permute.xlu0 %126 }
 0x17c   :  { %v129_v13 = vmul.f32 %v127_v12, %v115_v6 }
 0x17e   :  { %131 = vst.msk [vmem:[#allocation7] sm:$0xff] %vm130_vm2, %v129_v13 }
 0x17f   :  { %136 = vsyncadd [#allocation4], 96  ;;  %s257_s1 = smov [#allocation7]  }
 0x180   :  { %s137_s24 = sshll.u32 %s257_s1, 4  ;;  %s138_s24 = int_to_ptr.vmem [resolvable:$true] %s137_s24 }
 0x181   :  { %s222_s25 = scalar_lea.vmem %s138_s24, 32  ;;  %s226_s26 = scalar_lea.vmem %s138_s24, 128 }
 0x182   :  { %p223_p10 = scmp.ne.s32.totalorder %s138_s24, %s222_s25  ;;  %p227_p11 = scmp.lt.s32.totalorder %s138_s24, %s138_s24 }
 0x183   :  { %p228_p12 = scmp.lt.s32.totalorder %s226_s26, %s222_s25 }
 0x185   :  { %p229_p13 = por %p228_p12, %p227_p11 }
 0x187   :  { %p230_p0 = pnand %p229_p13, %p223_p10 }
 0x189   :  { %233 = shalt.err (!%p230_p0)
}
 0x18a   :  { %143 = dma.vmem_to_hbm [thread:$0]  %s138_s24, 32, %s290_s2, [#allocation4], %s249_s13, %s249_s13, %s250_s14  }
 0x18b   :  { %246 = dma.done.wait [#allocation4], 128  }
 0x18c   :  { %247 = vsyncadd [#allocation4], 4294967168 }
 0x18d   :  { %147 = vsyncpa [#allocation3], 1 }
 0x18e   :  { %148 = vsyncpa [#allocation6], 1 }
 0x18f   :  { %149 = vsyncpa [#allocation4], 1 }

</bundles_post_ra>
